<compile_context>
chip_gen: v6e
topology: v6e:2x2x1
jax: 0.10.0
libtpu: 0.0.40
codegen_flags: <defaults>
</compile_context>

<pallas_src>
import numpy as np
import jax
import jax.numpy as jnp
from jax.experimental import pallas as pl
from jax.experimental.pallas import tpu as pltpu


# ---------------------------------------------------------------------------
# small helpers
# ---------------------------------------------------------------------------
def _round_up(n, m):
    return ((n + m - 1) // m) * m


# ---------------------------------------------------------------------------
# host-side fold: conv + DVPP pools + fc + head  ->  per-voxel weight + bias
# (exact because everything in forward() is linear; vectorized numpy only)
# ---------------------------------------------------------------------------
def build_voxel_weight(params, patch_size, embed_dim, vol_shape):
    D, H, W = vol_shape
    pd, ph, pw = patch_size
    E = embed_dim
    Dp, Hp, Wp = D // pd, H // ph, W // pw
    Np, P = Dp * Hp * Wp, pd * ph * pw

    w_conv = np.asarray(params["w_conv"], np.float64).reshape(E, P)   # Cin == 1
    b_conv = np.asarray(params["b_conv"], np.float64)
    w_fc = np.asarray(params["w_fc"], np.float64)                     # (E, 73E)
    b_fc = np.asarray(params["b_fc"], np.float64)
    w_head = np.asarray(params["w_head"], np.float64)                 # (1, E)
    b_head = np.asarray(params["b_head"], np.float64)                 # (1,)

    # head(fc(cat)) == <cat, v> + (w_head @ b_fc + b_head)
    v = (w_head @ w_fc)[0]                                            # (73E,)

    # de-interleave v into bin-major (73, E) matching the channel-major concat:
    #   cat[c] = pool1, cat[E + c*8 + s] = pool2, cat[9E + c*64 + s] = pool3
    c = np.arange(E)
    w2 = np.empty((73, E), np.float64)
    w2[0] = v[c]
    w2[1:9] = v[E + c[None, :] * 8 + np.arange(8)[:, None]]
    w2[9:73] = v[9 * E + c[None, :] * 64 + np.arange(64)[:, None]]

    # fold the 1^3 and 2^3 pools into the 4^3 bins (exact: with Dp,Hp,Wp
    # divisible by 4 the coarse bins are averages of equal-size fine bins)
    d4, h4, w4 = np.meshgrid(np.arange(4), np.arange(4), np.arange(4), indexing="ij")
    parent2 = (((d4 // 2) * 2 + (h4 // 2)) * 2 + (w4 // 2)).reshape(-1)   # (64,)
    w64 = w2[9:73] + w2[1:9][parent2] / 8.0 + w2[0][None, :] / 64.0       # (64, E)

    # conv bias: every pool of a constant is that constant -> folds to a scalar
    bias = float(w64.sum(0) @ b_conv + (w_head @ b_fc + b_head)[0])

    # fold the patch-embed conv weight:  (64, E) @ (E, P) -> (64, P)
    w64p = w64 @ w_conv

    # expand fine bins to patches (each fine bin averages Np/64 patches) ...
    db = np.arange(Dp) // (Dp // 4)
    hb = np.arange(Hp) // (Hp // 4)
    wb = np.arange(Wp) // (Wp // 4)
    s4 = ((db[:, None, None] * 4 + hb[None, :, None]) * 4
          + wb[None, None, :]).reshape(-1)                                # (Np,)
    w_np = w64p[s4] * (64.0 / Np)                                         # (Np, P)

    # ... and scatter in-patch positions back onto the voxel grid
    w_vol = (w_np.reshape(Dp, Hp, Wp, pd, ph, pw)
             .transpose(0, 3, 1, 4, 2, 5)
             .reshape(D * H * W)).astype(np.float32)
    return w_vol, bias


# ---------------------------------------------------------------------------
# Pallas kernel wrapper: per-batch dot product  out[b] = <x[b], W_vol> + bias
# ---------------------------------------------------------------------------
def medvit3d_forward(x, params, patch_size, embed_dim):
    B, Cin, D, H, W = x.shape
    pd, ph, pw = patch_size
    if Cin != 1:
        raise ValueError("MedViT3DRegressor uses Conv3d(in_channels=1)")
    if D % pd or H % ph or W % pw:
        raise ValueError("volume dims must be divisible by patch_size")
    Dp, Hp, Wp = D // pd, H // ph, W // pw
    if Dp % 4 or Hp % 4 or Wp % 4:
        # TODO(synk): AdaptiveAvgPool3d with non-divisible bin edges not supported here.
        raise ValueError("feature grid (D/pd, H/ph, W/pw) must be divisible by 4")

    LANES = 128
    Nvox = D * H * W

    # ---- offline fold (whole forward is linear) ----
    w_vol_np, bias = build_voxel_weight(params, patch_size, embed_dim, (D, H, W))

    # ---- VMEM-budget-driven tiling (per generation) ----
    try:
        cap = int(getattr(pltpu.get_tpu_info(), "vmem_capacity_bytes", 64 * 2**20))
    except Exception:  # pragma: no cover - conservative fallback if query fails
        cap = 64 * 2**20
    usable = min(int(cap * 0.75), 112 * 2**20)      # ~48 MiB on v7x, ~96 MiB on v5e/v6e

    r_raw = pl.cdiv(Nvox, LANES)                    # voxel rows of width 128
    r8 = _round_up(r_raw, 8)
    row_bytes = LANES * 4                           # f32 rows
    w_bytes_est = r8 * row_bytes

    # keep W_vol resident (fetched once) when it comfortably fits
    resident = (2 * w_bytes_est) <= usable // 2
    if resident:
        rows_cap = (usable - 2 * w_bytes_est - (2 << 20)) // (3 * row_bytes)
    else:
        # fallback: W_vol is tiled and re-streamed once per batch element
        rows_cap = (usable - (2 << 20)) // (5 * row_bytes)

    r_tile = max(8, (min(r8, int(rows_cap), 16384) // 8) * 8)
    nt = pl.cdiv(r8, r_tile)
    r_tile = _round_up(pl.cdiv(r8, nt), 8)          # rebalance -> minimal zero padding
    r_total = nt * r_tile
    nvox_pad = r_total * LANES

    # ---- inputs: x stays f32, no patch extraction, no bf16/padded copy ----
    x_flat = x.reshape(B, Nvox)
    if nvox_pad != Nvox:
        x_flat = jnp.pad(x_flat, ((0, 0), (0, nvox_pad - Nvox)))
    xr = x_flat.reshape(B, r_total, LANES)

    w_pad = np.zeros((nvox_pad,), np.float32)
    w_pad[:Nvox] = w_vol_np
    w2d = jnp.asarray(w_pad.reshape(r_total, LANES))

    def kernel(x_ref, w_ref, out_ref, acc_ref):
        t = pl.program_id(1)

        @pl.when(t == 0)
        def _init():
            acc_ref[...] = jnp.zeros_like(acc_ref)

        if resident:
            r0 = pl.multiple_of(t * r_tile, 8)
            w_tile = w_ref[pl.ds(r0, r_tile), :]        # slice of the resident weight
        else:
            w_tile = w_ref[...]                         # streamed tile

        prod = x_ref[0] * w_tile                        # (r_tile, 128) f32, VPU
        acc_ref[...] += jnp.sum(prod, axis=0, keepdims=True)   # (1, 128) partials

        @pl.when(t == pl.num_programs(1) - 1)
        def _finalize():
            val = jnp.sum(acc_ref[...])
            out_ref[...] = jnp.full(out_ref.shape, val, jnp.float32)

    if resident:
        w_spec = pl.BlockSpec((r_total, LANES), lambda b, t: (0, 0))   # fetched once
    else:
        w_spec = pl.BlockSpec((r_tile, LANES), lambda b, t: (t, 0))

    # NOTE: for B == 1 on v7x both cores could split the voxel axis with partial
    # accumulators; omitted here for simplicity (no effect on v5e/v6e).
    out3d = pl.pallas_call(
        kernel,
        out_shape=jax.ShapeDtypeStruct((B, 1, LANES), jnp.float32),
        grid=(B, nt),
        in_specs=[
            pl.BlockSpec((1, r_tile, LANES), lambda b, t: (b, t, 0)),  # x tiles (pipelined)
            w_spec,                                                    # folded voxel weight
        ],
        out_specs=pl.BlockSpec((1, 1, LANES), lambda b, t: (b, 0, 0)),
        scratch_shapes=[pltpu.VMEM((1, LANES), jnp.float32)],
        compiler_params=pltpu.CompilerParams(
            dimension_semantics=("parallel", "arbitrary"),
            vmem_limit_bytes=int(usable)),
    )(xr, w2d)

    return out3d[:, 0, 0] + bias                                       # (B,) == .squeeze(1)


# ---------------------------------------------------------------------------
# deterministic synthetic parameters + pure-JAX f32 reference for verification
# ---------------------------------------------------------------------------
def init_params(key, embed_dim, patch_size):
    pd, ph, pw = patch_size
    E = embed_dim
    n_bins = 1 + 8 + 64
    ks = jax.random.split(key, 6)
    std = 0.02
    return {
        "w_conv": std * jax.random.normal(ks[0], (E, 1, pd, ph, pw), jnp.float32),
        "b_conv": std * jax.random.normal(ks[1], (E,), jnp.float32),
        "w_fc":   std * jax.random.normal(ks[2], (E, n_bins * E), jnp.float32),
        "b_fc":   std * jax.random.normal(ks[3], (E,), jnp.float32),
        "w_head": std * jax.random.normal(ks[4], (1, E), jnp.float32),
        "b_head": std * jax.random.normal(ks[5], (1,), jnp.float32),
    }


def reference_forward(x, params, patch_size):
    hi = jax.lax.Precision.HIGHEST
    pd, ph, pw = patch_size
    feat = jax.lax.conv_general_dilated(
        x, params["w_conv"], window_strides=(pd, ph, pw), padding="VALID",
        dimension_numbers=("NCDHW", "OIDHW", "NCDHW"), precision=hi)
    feat = feat + params["b_conv"][None, :, None, None, None]
    B, C, Dp, Hp, Wp = feat.shape
    p1 = feat.mean(axis=(2, 3, 4)).reshape(B, C)
    p2 = feat.reshape(B, C, 2, Dp // 2, 2, Hp // 2, 2, Wp // 2)\
             .mean(axis=(3, 5, 7)).reshape(B, C * 8)
    p3 = feat.reshape(B, C, 4, Dp // 4, 4, Hp // 4, 4, Wp // 4)\
             .mean(axis=(3, 5, 7)).reshape(B, C * 64)
    cat = jnp.concatenate([p1, p2, p3], axis=1)
    fc = jnp.dot(cat, params["w_fc"].T, precision=hi) + params["b_fc"]
    out = jnp.dot(fc, params["w_head"].T, precision=hi) + params["b_head"]
    return out[:, 0]


if __name__ == "__main__":
    B = 2
    D, H, W = 8, 16, 16           # small volume consistent with (B, 1, D, H, W) inputs
    patch_size = (2, 4, 4)        # -> feature grid (4, 4, 4), 64 patches
    embed_dim = 32

    key = jax.random.PRNGKey(0)
    kx, kp = jax.random.split(key)
    x = jax.random.normal(kx, (B, 1, D, H, W), jnp.float32)
    params = init_params(kp, embed_dim, patch_size)

    y = medvit3d_forward(x, params, patch_size, embed_dim)
    y = jax.block_until_ready(y)

    y_ref = reference_forward(x, params, patch_size)
    np.testing.assert_allclose(np.asarray(y), np.asarray(y_ref), rtol=2e-3, atol=2e-4)
    print("KERNEL_OK")
</pallas_src>

<mosaic_0001>
module attributes {stable_mosaic.version = 11 : i64} {
  func.func @kernel(%arg0: i32, %arg1: i32, %arg2: memref<1x16x128xf32, #tpu.memory_space<vmem>>, %arg3: memref<16x128xf32, #tpu.memory_space<vmem>>, %arg4: memref<1x1x128xf32, #tpu.memory_space<vmem>>, %arg5: memref<1x128xf32, #tpu.memory_space<vmem>>) attributes {dimension_semantics = [#tpu.dimension_semantics<parallel>, #tpu.dimension_semantics<arbitrary>], iteration_bounds = array<i64: 2, 1>, scalar_prefetch = 0 : i64, scratch_operands = 1 : i64, tpu.core_type = #tpu.core_type<tc>, window_params = [{transform_indices = @transform_0, window_bounds = array<i64: 1, 16, 128>}, {pipeline_mode = #tpu.pipeline_mode<synchronous>, transform_indices = @transform_1, window_bounds = array<i64: 16, 128>}, {transform_indices = @transform_2, window_bounds = array<i64: 1, 1, 128>}]} {
    %c0_i32 = arith.constant 0 : i32
    %0 = arith.cmpi eq, %arg1, %c0_i32 : i32
    %1 = arith.extui %0 : i1 to i32
    %c0_i32_0 = arith.constant 0 : i32
    %2 = arith.cmpi ne, %1, %c0_i32_0 : i32
    scf.if %2 {
      %cst_10 = arith.constant 0.000000e+00 : f32
      %18 = vector.broadcast %cst_10 : f32 to vector<1x128xf32>
      %c0_11 = arith.constant 0 : index
      %c0_12 = arith.constant 0 : index
      %19 = vector.load %arg5[%c0_11, %c0_12] : memref<1x128xf32, #tpu.memory_space<vmem>>, vector<1x128xf32>
      tpu.vector_store %arg5[%c0_11, %c0_12], %18 {strides = array<i32>} : memref<1x128xf32, #tpu.memory_space<vmem>>, vector<1x128xf32>,
    } else {
    }
    %c16_i32 = arith.constant 16 : i32
    %3 = arith.muli %arg1, %c16_i32 : i32
    %4 = tpu.assume_multiple %3, 8 : i32
    %5 = arith.index_cast %4 : i32 to index
    %c0 = arith.constant 0 : index
    %6 = vector.load %arg3[%5, %c0] : memref<16x128xf32, #tpu.memory_space<vmem>>, vector<16x128xf32>
    %c0_1 = arith.constant 0 : index
    %c0_2 = arith.constant 0 : index
    %c0_3 = arith.constant 0 : index
    %7 = vector.load %arg2[%c0_1, %c0_2, %c0_3] : memref<1x16x128xf32, #tpu.memory_space<vmem>>, vector<1x16x128xf32>
    %8 = vector.shape_cast %7 : vector<1x16x128xf32> to vector<16x128xf32>
    %9 = arith.mulf %8, %6 : vector<16x128xf32>
    %c0_4 = arith.constant 0 : index
    %c0_5 = arith.constant 0 : index
    %10 = vector.load %arg5[%c0_4, %c0_5] : memref<1x128xf32, #tpu.memory_space<vmem>>, vector<1x128xf32>
    %cst = arith.constant dense<0.000000e+00> : vector<128xf32>
    %11 = vector.multi_reduction <add>, %9, %cst [0] : vector<16x128xf32> to vector<128xf32>
    %12 = vector.shape_cast %11 : vector<128xf32> to vector<1x128xf32>
    %13 = arith.addf %10, %12 : vector<1x128xf32>
    %c0_6 = arith.constant 0 : index
    %c0_7 = arith.constant 0 : index
    %14 = vector.load %arg5[%c0_6, %c0_7] : memref<1x128xf32, #tpu.memory_space<vmem>>, vector<1x128xf32>
    tpu.vector_store %arg5[%c0_6, %c0_7], %13 {strides = array<i32>} : memref<1x128xf32, #tpu.memory_space<vmem>>, vector<1x128xf32>,
    %c0_i32_8 = arith.constant 0 : i32
    %15 = arith.cmpi eq, %arg1, %c0_i32_8 : i32
    %16 = arith.extui %15 : i1 to i32
    %c0_i32_9 = arith.constant 0 : i32
    %17 = arith.cmpi ne, %16, %c0_i32_9 : i32
    scf.if %17 {
      %c0_10 = arith.constant 0 : index
      %c0_11 = arith.constant 0 : index
      %18 = vector.load %arg5[%c0_10, %c0_11] : memref<1x128xf32, #tpu.memory_space<vmem>>, vector<1x128xf32>
      %19 = vector.shape_cast %18 : vector<1x128xf32> to vector<1x1x128xf32>
      %cst_12 = arith.constant dense<0.000000e+00> : vector<1xf32>
      %20 = vector.multi_reduction <add>, %19, %cst_12 [1, 2] : vector<1x1x128xf32> to vector<1xf32>
      %21 = vector.shape_cast %20 : vector<1xf32> to vector<1x1x1xf32>
      %22 = vector.extract %21[0, 0, 0] : f32 from vector<1x1x1xf32>
      %23 = vector.broadcast %22 : f32 to vector<1x1x128xf32>
      %c0_13 = arith.constant 0 : index
      %c0_14 = arith.constant 0 : index
      %c0_15 = arith.constant 0 : index
      %24 = vector.load %arg4[%c0_13, %c0_14, %c0_15] : memref<1x1x128xf32, #tpu.memory_space<vmem>>, vector<1x1x128xf32>
      tpu.vector_store %arg4[%c0_13, %c0_14, %c0_15], %23 {strides = array<i32>} : memref<1x1x128xf32, #tpu.memory_space<vmem>>, vector<1x1x128xf32>,
    } else {
    }
    return
  }
  func.func @transform_0(%arg0: i32, %arg1: i32) -> (i32, i32, i32) {
    %c0_i32 = arith.constant 0 : i32
    %c0_i32_0 = arith.constant 0 : i32
    return %arg0, %arg1, %c0_i32 : i32, i32, i32
  }
  func.func @transform_1(%arg0: i32, %arg1: i32) -> (i32, i32) {
    %c0_i32 = arith.constant 0 : i32
    %c0_i32_0 = arith.constant 0 : i32
    %c0_i32_1 = arith.constant 0 : i32
    return %c0_i32, %c0_i32_0 : i32, i32
  }
  func.func @transform_2(%arg0: i32, %arg1: i32) -> (i32, i32, i32) {
    %c0_i32 = arith.constant 0 : i32
    %c0_i32_0 = arith.constant 0 : i32
    %c0_i32_1 = arith.constant 0 : i32
    return %arg0, %c0_i32, %c0_i32_0 : i32, i32, i32
  }
}

</mosaic_0001>

<bundles_post_ra>
// kernel: tpu_custom_call.1
= control target key start
LH: loop header
LB: loop body
LE: loop exit
PB: predicated region body
PF: predicated region fallthrough
CT: control target
= control target key end

     0   :  { %7 = vsyncpa [#allocation4], 0  ;;  %s769_s0 = inlined_call_operand.hbm [shape: f32[2,16,128], index: 0, kind: input, shape index: {}]   ;;  %s770_s1 = inlined_call_operand.hbm [shape: f32[16,128], index: 1, kind: input, shape index: {}]   ;;  %s771_s2 = inlined_call_operand.hbm [shape: f32[2,1,128], index: 2, kind: output, shape index: {}]  }
   0x1   :  { %9 = vsyncpa [#allocation4 + $0x1], 0 }
   0x2   :  { %10 = vsyncpa [#allocation7], 0 }
   0x3   :  { %11 = vsyncpa [#allocation5], 0 }
   0x4   :  { %13 = vsyncpa [#allocation5 + $0x1], 0  ;;  %s589_s9 = smov 0   ;;  %s591_s10 = smov 0  }
   0x5   :  { %s593_s11 = smov 0   ;;  %s595_s12 = smov 0  }
   0x6   :  { %s597_s13 = smov 0   ;;  %s599_s14 = smov 0  }
   0x7 LB: > { %s335_s15 = sadd.s32 4294967295, %s566_s14   ;;  %s336_s16 = sadd.s32 4294967294, %s566_s14   ;;  %s566_s14 = sphi %s599_s14, %s19_s14   ;;  %s562_s13 = sphi %s597_s13, %s791_s13   ;;  %s558_s12 = sphi %s595_s12, %s790_s12   ;;  %s554_s11 = sphi %s593_s11, %s789_s11   ;;  %s550_s10 = sphi %s591_s10, %s788_s10   ;;  %s546_s9 = sphi %s589_s9, %s787_s9  }
   0x8   : > { %p53_p0 = scmp.ne.s32.totalorder %s550_s10, %s546_s9  ;;  %p623_p1 = scmp.eq.s32.totalorder %s335_s15, 0 }
   0x9   : > { %p627_p2 = scmp.eq.s32.totalorder %s335_s15, 1  ;;  %p104_p3 = scmp.eq.s32.totalorder %s336_s16, 1 }
   0xa   : > { %p633_p4 = por %p623_p1, %p53_p0  ;;  %p337_p5 = scmp.ge.s32.totalorder %s566_s14, 1 }
   0xb   : > { %p638_p6 = por %p104_p3, %p53_p0  ;;  %p111_p7 = scmp.lt.s32.totalorder %s566_s14, 3 }
   0xc   : > { %s776_s19 = scalar_select %p633_p4, 1, 0 }
   0xd   : > { %s777_s20 = scalar_select %p638_p6, 1, 0 }
   0xe   : > { %p643_p8 = pnand %p337_p5, %p111_p7  ;;  %s568_s22 = smov [#allocation6]  }
   0xf   : > { %s123_s23 = sshll.u32 %s568_s22, 4  ;;  %s31_s25 = sadd.s32 1, %s562_s13  ;;  %s124_s23 = int_to_ptr.vmem [resolvable:$true] %s123_s23 }
  0x10   : > { %p360_p9 = pneg %p643_p8  ;;  %s439_s26 = scalar_lea.vmem %s124_s23, 256 }
  0x11   : > { %p440_p13 = scmp.ne.s32.totalorder %s124_s23, %s439_s26  ;;  %p447_p5 = scmp.lt.s32.totalorder %s124_s23, %s124_s23 }
  0x12   : > { %p652_p11 = pnand %p360_p9, %p623_p1  ;;  %p448_p7 = scmp.lt.s32.totalorder %s439_s26, %s439_s26 }
  0x14   : > { %p430_p12 = pneg %p652_p11  ;;  %p449_p6 = por %p448_p7, %p447_p5 }
  0x16   : > { %p442_p0 = pnand %p440_p13, %p430_p12 }
  0x18   : > { %p443_p3 = pneg %p442_p0 }
  0x1a   : > { %p450_p4 = pnand %p449_p6, %p443_p3 }
  0x1c   : > { %453 = shalt.err (!%p450_p4)
}
  0x1d   : > { %s773_s27 = smov 128   ;;  %s570_s28 = smov 8  }
  0x1e   : > { %363 = dma.hbm_to_vmem [thread:$0]  (!%p652_p11), %s770_s1, 256, %s124_s23, [#allocation7], %s773_s27, %s773_s27, %s570_s28  }
  0x1f   : > { %p33_p4 = scmp.ge.s32.totalorder %s31_s25, 2  ;;  %s40_s3 = sadd.s32 1, %s554_s11 }
  0x20   : > { %p47_p6 = scmp.ne.s32.totalorder %s554_s11, %s550_s10  ;;  %p48_p9 = scmp.eq.s32.totalorder %s566_s14, 0 }
  0x21   : > { %s793_s25 = smov (%p33_p4, %s31_s25), 0  ;;  %p373_p0 = scmp.lt.s32.totalorder %s566_s14, 2 }
  0x22   : > { %p673_p12 = por %p48_p9, %p47_p6  ;;  %p679_p13 = por %p627_p2, %p47_p6 }
  0x23   : > { %s35_s6 = ssub.s32 %s562_s13, %s793_s25  ;;  %s137_s7 = sand.u32 1, %s554_s11  }
  0x24   : > { %p38_p11 = scmp.eq.s32.totalorder %s35_s6, 0  ;;  %s340_s8 = sshll.u32 %s137_s7, 4 }
  0x25   : > { %s349_s16 = sshll.u32 %s562_s13, 8  ;;  %s141_s26 = scalar_lea.vmem [#allocation3], %s340_s8 }
  0x26   : > { %s688_s15 = scalar_select %p38_p11, %s554_s11, %s40_s3  }
  0x27   : > { %s149_s24 = scalar_lea.hbm %s769_s0, %s349_s16  ;;  %s150_s29 = sshll.u32 %s141_s26, 4  ;;  %s151_s29 = int_to_ptr.vmem [resolvable:$true] %s150_s29 }
  0x28   : > { %p696_p2 = pnand %p373_p0, %p673_p12  ;;  %s138_s30 = scalar_lea.sflag [#allocation4], %s137_s7 }
  0x29   : > { %s467_s6 = scalar_lea.vmem %s151_s29, 256  ;;  %s571_s3 = smov [#allocation3]  }
  0x2a   : > { %p456_p3 = pneg %p696_p2  ;;  %p468_p5 = scmp.ne.s32.totalorder %s151_s29, %s467_s6 }
  0x2b   : > { %s472_s27 = sshll.u32 %s571_s3, 4  ;;  %s473_s27 = int_to_ptr.vmem [resolvable:$false] %s472_s27 }
  0x2c   : > { %p470_p7 = pnand %p468_p5, %p456_p3  ;;  %s474_s16 = scalar_lea.vmem %s473_s27, 512 }
  0x2d   : > { %p475_p6 = scmp.lt.s32.totalorder %s151_s29, %s473_s27  ;;  %p476_p9 = scmp.lt.s32.totalorder %s474_s16, %s467_s6 }
  0x2e   : > { %p471_p4 = pneg %p470_p7 }
  0x2f   : > { %p477_p11 = por %p476_p9, %p475_p6 }
  0x31   : > { %p478_p10 = pnand %p477_p11, %p471_p4 }
  0x33   : > { %481 = shalt.err (!%p478_p10)
}
  0x34   : > { %s783_s4 = smov 128   ;;  %162 = sbr.rel (%p643_p8) target bundleno = 303 (0x12f), region = 28 }
  0x35   : > { %367 = dma.hbm_to_vmem [thread:$0]  (!%p696_p2), %s149_s24, 256, %s151_s29, %s138_s30, %s783_s4, %s783_s4, %s570_s28  }
  0x36   : > { %s710_s7 = sand.u32 (!%p643_p8), 1, %s550_s10   ;;  %p784_p12 = scmp.ne.s32.totalorder (!%p643_p8), %s776_s19, 0 }
  0x37   : > { %s344_s27 = sshll.u32 (!%p643_p8), %s710_s7, 4  ;;  %s165_s8 = scalar_lea.sflag (!%p643_p8), [#allocation4], %s710_s7 }
  0x38   : > { %s168_s22 = scalar_lea.vmem (!%p643_p8), [#allocation3], %s344_s27 }
  0x39   : > { %533 = dma.done.wait (%p784_p12), %s165_s8, 256  }
  0x3a   : > { %535 = vsyncadd (%p784_p12), %s165_s8, 4294967040 }
  0x3b   : > { %537 = dma.done.wait (%p623_p1), [#allocation7], 256  }
  0x3c   : > { %539 = vsyncadd (%p623_p1), [#allocation7], 4294967040  ;;  %v572_v0 = vmov 0.0   ;;  %v200_v1 = vld [vmem:[#allocation6] sm:$0xff]  ;;  %v201_v2 = vld [vmem:[#allocation6 + $0x8] sm:$0xff]  ;;  %vm220_vm0 = vcmask 1040384  }
  0x3d   : > { %197 = vst [vmem:[#allocation2] sm:$0x1] %v572_v0  ;;  %v202_v3 = vld [vmem:[%s168_s22] sm:$0xff]  ;;  %v203_v4 = vld [vmem:[%s168_s22 + $0x8] sm:$0xff]  ;;  %s191_s17 = scalar_lea.vmem [#allocation8], %s710_s7  ;;  %s346_s21 = sshll.u32 %s558_s12, 4 }
  0x3e   : > { %v204_v5 = vmul.f32 %v202_v3, %v200_v1  ;;  %v205_v6 = vmul.f32 %v203_v4, %v201_v2  ;;  %s246_s19 = sshll.u32 %s191_s17, 4  ;;  %s244_s26 = scalar_lea.hbm %s771_s2, %s346_s21  ;;  %s724_s19 = int_to_ptr.vmem [resolvable:$true] %s246_s19 }
  0x3f   : > { %s234_s29 = scalar_lea.sflag [#allocation5], %s710_s7  ;;  %s482_s18 = scalar_lea.vmem %s724_s19, 16 }
  0x40   : > { %v207_v7 = vadd.f32 %v205_v6, %v204_v5  ;;  %p483_p1 = scmp.ne.s32.totalorder %s724_s19, %s482_s18  ;;  %s573_s30 = smov [#allocation8]  }
  0x41   : > { %s486_s12 = sshll.u32 %s573_s30, 4  ;;  %s487_s12 = int_to_ptr.vmem [resolvable:$false] %s486_s12 }
  0x42   : > { %v208_v8 = vrot.slane %v207_v7, 4  ;;  %p484_p8 = pnand %p483_p1, %p679_p13  ;;  %s488_s6 = scalar_lea.vmem %s487_s12, 32 }
  0x43   : > { %p489_p0 = scmp.lt.s32.totalorder %s724_s19, %s487_s12  ;;  %p490_p2 = scmp.lt.s32.totalorder %s488_s6, %s482_s18 }
  0x44   : > { %v209_v9 = vadd.f32 %v208_v8, %v207_v7  ;;  %v206_v13 = vld [vmem:[#allocation2] sm:$0x1]  ;;  %p485_p10 = pneg %p484_p8 }
  0x45   : > { %p491_p3 = por %p490_p2, %p489_p0 }
  0x46   : > { %v210_v10 = vrot.slane %v209_v9, 2 }
  0x47   : > { %p492_p5 = pnand %p491_p3, %p485_p10 }
  0x48   : > { %v211_v11 = vadd.f32 %v210_v10, %v209_v9 }
  0x4a   : > { %v212_v12 = vrot.slane %v211_v11, 1 }
  0x4c   : > { %v213_v14 = vadd.f32 %v212_v12, %v211_v11 }
  0x4e   : > { %v214_v15 = vadd.f32 %v213_v14, %v206_v13 }
  0x50   : > { %215 = vst [vmem:[#allocation2] sm:$0x1] %v214_v15 }
  0x57   : > { %v219_v16 = vld [vmem:[#allocation2] sm:$0x1] }
  0x58   : > { %v221_v17 = vsel %vm220_vm0, %v219_v16, 0.0 }
  0x59   : > { %222 = vadd.xlane.f32.xlu0 %v221_v17 }
  0xe2   : > { %v223_v18 = vpop.xlane.xlu0 %222 }
  0xe3   : > { %v224_v19 = vrot.slane %v223_v18, 4 }
  0xe5   : > { %v225_v20 = vadd.f32 %v224_v19, %v223_v18 }
  0xe7   : > { %v226_v21 = vrot.slane %v225_v20, 2 }
  0xe9   : > { %v227_v22 = vadd.f32 %v226_v21, %v225_v20 }
  0xeb   : > { %v228_v23 = vrot.slane %v227_v22, 1 }
  0xed   : > { %v229_v24 = vadd.f32 %v228_v23, %v227_v22 }
  0xef   : > { %350 = vpush %v229_v24 }
 0x120   : > { %s351_s28 = spop %350 }
 0x121   : > { %v231_v25 = vstv %s351_s28 }
 0x122   : > { %232 = vst [vmem:[%s191_s17] sm:$0x1] %v231_v25 }
 0x123   : > { %495 = shalt.err (!%p492_p5)
}
 0x124   : > { %s496_s3 = scalar_lea.hbm %s244_s26, 16  ;;  %s500_s7 = scalar_lea.hbm %s771_s2, 32 }
 0x125   : > { %p497_p7 = scmp.ne.s32.totalorder %s244_s26, %s496_s3  ;;  %p501_p9 = scmp.lt.s32.totalorder %s244_s26, %s771_s2 }
 0x126   : > { %p502_p11 = scmp.lt.s32.totalorder %s500_s7, %s496_s3 }
 0x127   : > { %p498_p4 = pnand %p497_p7, %p679_p13 }
 0x128   : > { %p503_p12 = por %p502_p11, %p501_p9 }
 0x129   : > { %p499_p6 = pneg %p498_p4 }
 0x12b   : > { %p504_p1 = pnand %p503_p12, %p499_p6 }
 0x12d   : > { %507 = shalt.err (!%p504_p1)
}
 0x12e   : > { %358 = dma.vmem_to_hbm [thread:$0]  (%p679_p13), %s724_s19, 16, %s244_s26, %s234_s29  }
 0x12f PF: > { %s258_s22 = sand.u32 1, %s546_s9   ;;  %p785_p8 = scmp.ne.s32.totalorder %s777_s20, 0 }
 0x130   : > { %p786_p10 = scmp.ge.s32.totalorder %s566_s14, 2  ;;  %s259_s17 = scalar_lea.sflag [#allocation5], %s258_s22 }
 0x132   : > { %p369_p0 = pnand %p786_p10, %p785_p8 }
 0x134   : > { %p370_p2 = pneg %p369_p0 }
 0x136   : > { %541 = dma.done.wait (%p370_p2), %s259_s17, 16  }
 0x137   : > { %543 = vsyncadd (%p370_p2), %s259_s17, 4294967280  ;;  %s19_s14 = sadd.s32 1, %s566_s14   ;;  %s787_s9 = smov %s550_s10 }
 0x138   : > { %p16_p3 = scmp.ge.s32.totalorder %s19_s14, 4   ;;  %s788_s10 = smov %s554_s11 }
 0x139   : > { %s789_s11 = smov %s688_s15  ;;  %s790_s12 = smov %s562_s13 }
 0x13a   : > { %s791_s13 = smov %s793_s25  ;;  %18 = sbr.rel (!%p16_p3) target bundleno = 7 (0x7), region = 86 }
 0x13f   :  { %263 = vsyncpa [#allocation4], 1 }
 0x140   :  { %265 = vsyncpa [#allocation4 + $0x1], 1 }
 0x141   :  { %266 = vsyncpa [#allocation7], 1 }
 0x142   :  { %267 = vsyncpa [#allocation5], 1 }
 0x143   :  { %269 = vsyncpa [#allocation5 + $0x1], 1 }

</bundles_post_ra>
